<compile_context>
chip_gen: v5e
topology: v5e:2x2
jax: 0.10.0
libtpu: 0.0.40
codegen_flags: <defaults>
</compile_context>

<pallas_src>
import functools

import jax
import jax.numpy as jnp
from jax.experimental import pallas as pl
from jax.experimental.pallas import tpu as pltpu

DIM_IN = 32          # Encoder dim_in
DIM_RBF = 16         # Encoder dim_rbf
RADIUS = 5.0
NPACK = 4            # nodes packed per row : 4 * dim_in = 128 output lanes (lane-dense)
EPACK = 8            # edges packed per row : 8 * dim_in = 256 output lanes (lane-dense)
VMEM_LIMIT = 32 * 1024 * 1024


def _silu(x):
    # SiLU via tanh:  x * sigmoid(x) = 0.5 * x * (1 + tanh(x/2))  -> one EUP op.
    return 0.5 * x * (1.0 + jnp.tanh(0.5 * x))


def _round_up(n, m):
    return ((n + m - 1) // m) * m


def _pick_tile(rows, tile_default, granule=16):
    """Tile (in packed rows) that avoids huge padding on small inputs and, when possible,
    yields >= 2 grid steps so the 'parallel' axis can feed both TensorCores on v7x."""
    rows = max(rows, 1)
    n_steps = max(pl.cdiv(rows, tile_default), 2 if rows > granule else 1)
    return max(_round_up(pl.cdiv(rows, n_steps), granule), granule)


def _bf16_elementwise_supported():
    # v6e / v7x have bf16 VPU + EUP; v5e (and older) do not -> keep f32 elementwise there.
    try:
        kind = jax.devices()[0].device_kind.lower()
    except Exception:
        return False
    return ("v6" in kind) or ("v7" in kind)


# ----------------------------- node encoder kernel -----------------------------
def encoder_atom_kernel(x_ref, w_ref, b_ref, o_ref, *, compute_dtype):
    # x_ref: [tile, NPACK*2D] bf16 (4 nodes packed per row)
    # w_ref: block-diagonal [NPACK*2D, NPACK*D] bf16, b_ref: [1, NPACK*D] f32
    x = x_ref[...].astype(compute_dtype)                 # bf16 elementwise on v6e/v7x
    h = _silu(x)                                         # SiLU(embedding + temp_proj)
    y = jnp.dot(h.astype(jnp.bfloat16), w_ref[...],
                preferred_element_type=jnp.float32) + b_ref[...]
    o_ref[...] = _silu(y).astype(o_ref.dtype)            # SiLU(Linear(2D, D)), bf16 store


def encoder_atom(x_pre, w_a, b_a, *, tile=2048, out_dtype=jnp.bfloat16):
    """x_pre: [N, 2D] f32 = embedding(batch.x) + temperature_proj(T)[batch] -> [N, D]."""
    N, C2 = x_pre.shape
    D = w_a.shape[1]

    Np = pl.cdiv(max(N, 1), NPACK)                       # packed rows needed
    tile = _pick_tile(Np, tile)
    Np_pad = _round_up(Np, tile)
    n_pad = Np_pad * NPACK

    x_bf = x_pre.astype(jnp.bfloat16)
    if n_pad != N:
        x_bf = jnp.pad(x_bf, ((0, n_pad - N), (0, 0)))
    x_packed = x_bf.reshape(Np_pad, NPACK * C2)          # [Np_pad, 256] lane-dense

    # Block-diagonal weight so 4 packed nodes share one lane-dense MXU pass.
    w_bd = jnp.kron(jnp.eye(NPACK, dtype=jnp.float32), w_a).astype(jnp.bfloat16)  # [256,128]
    b_bd = jnp.tile(b_a.reshape(1, D), (1, NPACK)).astype(jnp.float32)            # [1, 128]

    compute_dtype = jnp.bfloat16 if _bf16_elementwise_supported() else jnp.float32
    kernel = functools.partial(encoder_atom_kernel, compute_dtype=compute_dtype)

    cost = pl.CostEstimate(
        flops=2 * Np_pad * (NPACK * C2) * (NPACK * D),
        transcendentals=n_pad * (C2 + D),
        bytes_accessed=int(x_packed.size) * 2
                       + Np_pad * NPACK * D * jnp.dtype(out_dtype).itemsize
                       + int(w_bd.size) * 2 + int(b_bd.size) * 4,
    )

    out_packed = pl.pallas_call(
        kernel,
        out_shape=jax.ShapeDtypeStruct((Np_pad, NPACK * D), out_dtype),
        grid_spec=pltpu.PrefetchScalarGridSpec(
            num_scalar_prefetch=0,
            grid=(Np_pad // tile,),
            in_specs=[
                pl.BlockSpec((tile, NPACK * C2), lambda i: (i, 0)),
                pl.BlockSpec((NPACK * C2, NPACK * D), lambda i: (0, 0)),
                pl.BlockSpec((1, NPACK * D), lambda i: (0, 0)),
            ],
            out_specs=pl.BlockSpec((tile, NPACK * D), lambda i: (i, 0)),
        ),
        compiler_params=pltpu.CompilerParams(dimension_semantics=("parallel",),
                                             vmem_limit_bytes=VMEM_LIMIT),
        cost_estimate=cost,
    )(x_packed, w_bd, b_bd)

    return out_packed.reshape(n_pad, D)[:N]


# ----------------------------- edge encoder kernel -----------------------------
def encoder_edge_kernel(geo_ref, means_ref, betas_ref, w1_ref, b1_ref, w2_ref, b2_ref,
                        o_ref, *, alpha, cutoff_upper, epack, n_rbf):
    geo = geo_ref[...]                                   # [tile, EPACK*4] f32 (d,dx,dy,dz)*8
    tile = geo.shape[0]

    # Broadcast each packed edge's distance across its R rbf lanes -> lane-dense [tile, 128].
    d_b = jnp.concatenate(
        [jnp.broadcast_to(geo[:, 4 * p:4 * p + 1], (tile, n_rbf)) for p in range(epack)],
        axis=-1)

    # ExpNormalSmearing (cutoff_lower=0) with CosineCutoff envelope, all transcendentals
    # evaluated on the lane-dense layout.
    cutoff = 0.5 * (jnp.cos(d_b * (jnp.pi / cutoff_upper)) + 1.0)
    cutoff = jnp.where(d_b < cutoff_upper, cutoff, 0.0)
    rbf = cutoff * jnp.exp(-betas_ref[...] * (jnp.exp(-alpha * d_b) - means_ref[...]) ** 2)

    # Linear(R+3, 2D) for all EPACK edges in ONE block-diagonal MXU pass: the weight has
    # zero rows for the dist lanes of `geo`, so `geo` can be appended unmodified.
    inp = jnp.concatenate([rbf, geo], axis=-1).astype(jnp.bfloat16)   # [tile, EPACK*(R+4)]
    h = jnp.dot(inp, w1_ref[...], preferred_element_type=jnp.float32) + b1_ref[...]
    h = _silu(h)
    y = jnp.dot(h.astype(jnp.bfloat16), w2_ref[...],
                preferred_element_type=jnp.float32) + b2_ref[...]
    o_ref[...] = _silu(y).astype(o_ref.dtype)            # [tile, EPACK*D] = 256 lanes, bf16


def encoder_edge(cart_dist, cart_dir, means, betas, w1, b1, w2, b2, *,
                 radius, tile=1024, out_dtype=jnp.bfloat16):
    E = cart_dist.shape[0]
    R = means.shape[-1]
    C2 = w1.shape[1]            # 2 * dim_in
    D = w2.shape[1]             # dim_in

    Ep = pl.cdiv(max(E, 1), EPACK)                       # packed rows needed
    tile = _pick_tile(Ep, tile)
    Ep_pad = _round_up(Ep, tile)
    e_pad = Ep_pad * EPACK

    # Merge dist + dir into one array; d=0 padding rows are numerically safe (sliced off).
    geo = jnp.concatenate([cart_dist.reshape(E, 1), cart_dir], axis=-1).astype(jnp.float32)
    if e_pad != E:
        geo = jnp.pad(geo, ((0, e_pad - E), (0, 0)))
    geo_packed = geo.reshape(Ep_pad, EPACK * 4)          # [Ep_pad, 32]

    # Block-diagonal weights so EPACK edges share one lane-dense MXU pass per layer.
    eye = jnp.eye(EPACK, dtype=jnp.float32)
    w1_rbf_bd = jnp.kron(eye, w1[:R])                                        # [128, 512]
    w1_geo_bd = jnp.kron(eye, jnp.concatenate(
        [jnp.zeros((1, C2), w1.dtype), w1[R:]], axis=0))                     # [ 32, 512]
    w1_bd = jnp.concatenate([w1_rbf_bd, w1_geo_bd], axis=0).astype(jnp.bfloat16)  # [160, 512]
    w2_bd = jnp.kron(eye, w2).astype(jnp.bfloat16)                           # [512, 256]
    b1_bd = jnp.tile(b1.reshape(1, C2), (1, EPACK)).astype(jnp.float32)      # [1, 512]
    b2_bd = jnp.tile(b2.reshape(1, D), (1, EPACK)).astype(jnp.float32)       # [1, 256]
    means_t = jnp.tile(means.reshape(1, R), (1, EPACK)).astype(jnp.float32)  # [1, 128]
    betas_t = jnp.tile(betas.reshape(1, R), (1, EPACK)).astype(jnp.float32)  # [1, 128]

    alpha = 5.0 / radius                                 # cutoff_lower = 0
    kernel = functools.partial(encoder_edge_kernel, alpha=alpha, cutoff_upper=radius,
                               epack=EPACK, n_rbf=R)

    k1, n1 = EPACK * (R + 4), EPACK * C2
    k2, n2 = EPACK * C2, EPACK * D
    cost = pl.CostEstimate(
        flops=2 * Ep_pad * (k1 * n1 + k2 * n2),
        transcendentals=Ep_pad * (3 * EPACK * R + n1 + n2),
        bytes_accessed=int(geo_packed.size) * 4
                       + Ep_pad * n2 * jnp.dtype(out_dtype).itemsize
                       + int(w1_bd.size + w2_bd.size) * 2
                       + int(b1_bd.size + b2_bd.size + means_t.size + betas_t.size) * 4,
    )

    out_packed = pl.pallas_call(
        kernel,
        out_shape=jax.ShapeDtypeStruct((Ep_pad, EPACK * D), out_dtype),
        grid_spec=pltpu.PrefetchScalarGridSpec(
            num_scalar_prefetch=0,
            grid=(Ep_pad // tile,),
            in_specs=[
                pl.BlockSpec((tile, EPACK * 4), lambda i: (i, 0)),
                pl.BlockSpec((1, EPACK * R), lambda i: (0, 0)),
                pl.BlockSpec((1, EPACK * R), lambda i: (0, 0)),
                pl.BlockSpec((EPACK * (R + 4), EPACK * C2), lambda i: (0, 0)),
                pl.BlockSpec((1, EPACK * C2), lambda i: (0, 0)),
                pl.BlockSpec((EPACK * C2, EPACK * D), lambda i: (0, 0)),
                pl.BlockSpec((1, EPACK * D), lambda i: (0, 0)),
            ],
            out_specs=pl.BlockSpec((tile, EPACK * D), lambda i: (i, 0)),
        ),
        compiler_params=pltpu.CompilerParams(dimension_semantics=("parallel",),
                                             vmem_limit_bytes=VMEM_LIMIT),
        cost_estimate=cost,
    )(geo_packed, means_t, betas_t, w1_bd, b1_bd, w2_bd, b2_bd)

    return out_packed.reshape(e_pad, D)[:E]


# ----------------------------- pure-JAX f32 references -----------------------------
def reference_node(x_pre, w_a, b_a):
    # encoder_atom = Sequential(SiLU, Linear(2D, D), SiLU) on embedding + temperature_proj
    h = jax.nn.silu(x_pre)
    return jax.nn.silu(h @ w_a + b_a)


def reference_edge(cart_dist, cart_dir, means, betas, w1, b1, w2, b2, radius):
    d = cart_dist[:, None]
    cutoff = 0.5 * (jnp.cos(d * jnp.pi / radius) + 1.0) * (d < radius)
    rbf = cutoff * jnp.exp(-betas * (jnp.exp(-(5.0 / radius) * d) - means) ** 2)
    e = jnp.concatenate([rbf, cart_dir], axis=-1)
    e = jax.nn.silu(e @ w1 + b1)
    e = jax.nn.silu(e @ w2 + b2)
    return e


if __name__ == "__main__":
    key = jax.random.PRNGKey(0)
    ks = jax.random.split(key, 12)

    N, E, B = 16, 32, 2            # nodes, edges, graphs in the toy batch
    D, R = DIM_IN, DIM_RBF

    # ----------------- synthetic "batch" inputs -----------------
    atomic_numbers = jax.random.randint(ks[0], (N,), 1, 119)                     # batch.x
    batch_idx = jnp.concatenate([jnp.zeros(N // 2, jnp.int32),
                                 jnp.ones(N // 2, jnp.int32)])                   # batch.batch
    # Normalized temperature keeps toy activations O(1) so the bf16-vs-f32 check is tight.
    temperature = jax.random.uniform(ks[1], (B,), minval=0.0, maxval=1.0)        # batch.temperature
    cart_dist = jax.random.uniform(ks[2], (E,), minval=0.5, maxval=RADIUS + 1.0) # batch.cart_dist
    dir_raw = jax.random.normal(ks[3], (E, 3))
    cart_dir = dir_raw / jnp.linalg.norm(dir_raw, axis=-1, keepdims=True)        # batch.cart_dir

    # ----------------- deterministic parameters -----------------
    def uniform(k, shape, fan_in, fan_out):
        lim = jnp.sqrt(6.0 / (fan_in + fan_out))
        return jax.random.uniform(k, shape, minval=-lim, maxval=lim, dtype=jnp.float32)

    emb_table = uniform(ks[4], (119, 2 * D), 119, 2 * D)          # nn.Embedding(119, 2*dim_in)
    w_t = uniform(ks[5], (1, 2 * D), 1, 2 * D)                    # temperature_proj_atom
    b_t = jnp.zeros((2 * D,), jnp.float32)
    w_a = uniform(ks[6], (2 * D, D), 2 * D, D)                    # encoder_atom Linear(2D, D)
    b_a = 0.1 * uniform(ks[9], (D,), 2 * D, D)
    w_e1 = uniform(ks[7], (R + 3, 2 * D), R + 3, 2 * D)           # encoder_edge Linear(R+3, 2D)
    b_e1 = 0.1 * uniform(ks[10], (2 * D,), R + 3, 2 * D)
    w_e2 = uniform(ks[8], (2 * D, D), 2 * D, D)                   # encoder_edge Linear(2D, D)
    b_e2 = 0.1 * uniform(ks[11], (D,), 2 * D, D)

    # ExpNormalSmearing constants (cutoff_lower=0, cutoff_upper=RADIUS, trainable=False)
    start_value = jnp.exp(jnp.float32(-RADIUS))
    means = jnp.linspace(start_value, 1.0, R, dtype=jnp.float32)[None, :]          # [1, R]
    betas = jnp.full((1, R), (2.0 / R * (1.0 - start_value)) ** -2, jnp.float32)   # [1, R]

    # ----------------- XLA glue: gathers + single pre-add -----------------
    # TODO(synk): the embedding gather + per-graph temperature indexing stay in XLA; a
    # data-dependent gather is not a good fit for a tiled TPU Pallas kernel.
    temp_proj = temperature[:, None] @ w_t + b_t                  # [B, 2D]
    x_pre = emb_table[atomic_numbers] + temp_proj[batch_idx]      # [N, 2D]

    # ----------------- Pallas kernels -----------------
    node_out = encoder_atom(x_pre, w_a, b_a)                                  # batch.x (bf16)
    edge_out = encoder_edge(cart_dist, cart_dir, means, betas,
                            w_e1, b_e1, w_e2, b_e2, radius=RADIUS)            # batch.edge_attr
    jax.block_until_ready((node_out, edge_out))

    # ----------------- correctness check vs the true f32 reference -----------------
    ref_node = reference_node(x_pre, w_a, b_a)
    ref_edge = reference_edge(cart_dist, cart_dir, means, betas,
                              w_e1, b_e1, w_e2, b_e2, RADIUS)
    assert node_out.shape == (N, D) and edge_out.shape == (E, D)
    assert jnp.allclose(node_out.astype(jnp.float32), ref_node,
                        rtol=3e-2, atol=3e-2), "node encoder mismatch"
    assert jnp.allclose(edge_out.astype(jnp.float32), ref_edge,
                        rtol=3e-2, atol=3e-2), "edge encoder mismatch"

    print("KERNEL_OK")
</pallas_src>

<mosaic_0001>
module attributes {stable_mosaic.version = 11 : i64} {
  func.func @encoder_atom_kernel(%arg0: i32, %arg1: memref<16x256xbf16, #tpu.memory_space<vmem>>, %arg2: memref<256x128xbf16, #tpu.memory_space<vmem>>, %arg3: memref<1x128xf32, #tpu.memory_space<vmem>>, %arg4: memref<16x128xbf16, #tpu.memory_space<vmem>>) attributes {dimension_semantics = [#tpu.dimension_semantics<parallel>], iteration_bounds = array<i64: 1>, scalar_prefetch = 0 : i64, scratch_operands = 0 : i64, tpu.core_type = #tpu.core_type<tc>, window_params = [{transform_indices = @transform_0, window_bounds = array<i64: 16, 256>}, {pipeline_mode = #tpu.pipeline_mode<synchronous>, transform_indices = @transform_1, window_bounds = array<i64: 256, 128>}, {pipeline_mode = #tpu.pipeline_mode<synchronous>, transform_indices = @transform_2, window_bounds = array<i64: 1, 128>}, {transform_indices = @transform_3, window_bounds = array<i64: 16, 128>}]} {
    %c0 = arith.constant 0 : index
    %c0_0 = arith.constant 0 : index
    %0 = vector.load %arg1[%c0, %c0_0] : memref<16x256xbf16, #tpu.memory_space<vmem>>, vector<16x256xbf16>
    %1 = arith.extf %0 : vector<16x256xbf16> to vector<16x256xf32>
    %cst = arith.constant 5.000000e-01 : f32
    %2 = vector.broadcast %cst : f32 to vector<16x256xf32>
    %3 = arith.mulf %2, %1 : vector<16x256xf32>
    %cst_1 = arith.constant 5.000000e-01 : f32
    %4 = vector.broadcast %cst_1 : f32 to vector<16x256xf32>
    %5 = arith.mulf %4, %1 : vector<16x256xf32>
    %6 = math.tanh %5 : vector<16x256xf32>
    %cst_2 = arith.constant 1.000000e+00 : f32
    %7 = vector.broadcast %cst_2 : f32 to vector<16x256xf32>
    %8 = arith.addf %7, %6 : vector<16x256xf32>
    %9 = arith.mulf %3, %8 : vector<16x256xf32>
    %10 = arith.truncf %9 : vector<16x256xf32> to vector<16x256xbf16>
    %c0_3 = arith.constant 0 : index
    %c0_4 = arith.constant 0 : index
    %11 = vector.load %arg2[%c0_3, %c0_4] : memref<256x128xbf16, #tpu.memory_space<vmem>>, vector<256x128xbf16>
    %cst_5 = arith.constant dense<0.000000e+00> : vector<16x128xf32>
    %12 = tpu.matmul %10, %11, %cst_5 {dimension_numbers = #tpu.dot_dimension_numbers<[1], [0], [0], [1], [0, 0, 1, 1], [], []>} : vector<16x256xbf16>, vector<256x128xbf16>, vector<16x128xf32> -> vector<16x128xf32>
    %c0_6 = arith.constant 0 : index
    %c0_7 = arith.constant 0 : index
    %13 = vector.load %arg3[%c0_6, %c0_7] : memref<1x128xf32, #tpu.memory_space<vmem>>, vector<1x128xf32>
    %14 = vector.broadcast %13 : vector<1x128xf32> to vector<16x128xf32>
    %15 = arith.addf %12, %14 : vector<16x128xf32>
    %cst_8 = arith.constant 5.000000e-01 : f32
    %16 = vector.broadcast %cst_8 : f32 to vector<16x128xf32>
    %17 = arith.mulf %16, %15 : vector<16x128xf32>
    %cst_9 = arith.constant 5.000000e-01 : f32
    %18 = vector.broadcast %cst_9 : f32 to vector<16x128xf32>
    %19 = arith.mulf %18, %15 : vector<16x128xf32>
    %20 = math.tanh %19 : vector<16x128xf32>
    %cst_10 = arith.constant 1.000000e+00 : f32
    %21 = vector.broadcast %cst_10 : f32 to vector<16x128xf32>
    %22 = arith.addf %21, %20 : vector<16x128xf32>
    %23 = arith.mulf %17, %22 : vector<16x128xf32>
    %24 = arith.truncf %23 : vector<16x128xf32> to vector<16x128xbf16>
    %c0_11 = arith.constant 0 : index
    %c0_12 = arith.constant 0 : index
    %25 = vector.load %arg4[%c0_11, %c0_12] : memref<16x128xbf16, #tpu.memory_space<vmem>>, vector<16x128xbf16>
    tpu.vector_store %arg4[%c0_11, %c0_12], %24 {strides = array<i32>} : memref<16x128xbf16, #tpu.memory_space<vmem>>, vector<16x128xbf16>,
    return
  }
  func.func @transform_0(%arg0: i32) -> (i32, i32) {
    %c0_i32 = arith.constant 0 : i32
    %c0_i32_0 = arith.constant 0 : i32
    return %arg0, %c0_i32 : i32, i32
  }
  func.func @transform_1(%arg0: i32) -> (i32, i32) {
    %c0_i32 = arith.constant 0 : i32
    %c0_i32_0 = arith.constant 0 : i32
    %c0_i32_1 = arith.constant 0 : i32
    return %c0_i32, %c0_i32_0 : i32, i32
  }
  func.func @transform_2(%arg0: i32) -> (i32, i32) {
    %c0_i32 = arith.constant 0 : i32
    %c0_i32_0 = arith.constant 0 : i32
    %c0_i32_1 = arith.constant 0 : i32
    return %c0_i32, %c0_i32_0 : i32, i32
  }
  func.func @transform_3(%arg0: i32) -> (i32, i32) {
    %c0_i32 = arith.constant 0 : i32
    %c0_i32_0 = arith.constant 0 : i32
    return %arg0, %c0_i32 : i32, i32
  }
}

</mosaic_0001>

<bundles_post_ra>
// kernel: tpu_custom_call.1
= control target key start
LH: loop header
LB: loop body
LE: loop exit
PB: predicated region body
PF: predicated region fallthrough
CT: control target
= control target key end

     0   :  { %8 = vsyncpa [#allocation3], 0  ;;  %s491_s0 = inlined_call_operand.hbm [shape: bf16[16,256], index: 0, kind: input, shape index: {}]   ;;  %s492_s1 = inlined_call_operand.hbm [shape: bf16[256,128], index: 1, kind: input, shape index: {}]   ;;  %s493_s2 = inlined_call_operand.vmem [shape: f32[1,128], index: 2, kind: input, shape index: {}]   ;;  %s494_s3 = inlined_call_operand.hbm [shape: bf16[16,128], index: 3, kind: output, shape index: {}]  }
   0x1   :  { %9 = vsyncpa [#allocation6], 0 }
   0x2   :  { %10 = vsyncpa [#allocation4], 0  ;;  %s15_s14 = sshll.u32 %s491_s0, 4  ;;  %s446_s15 = smov [#allocation2]   ;;  %s16_s14 = int_to_ptr.hbm [resolvable:$true] %s15_s14 }
   0x3   :  { %s17_s16 = sshll.u32 %s446_s15, 4  ;;  %s28_s19 = sshll.u32 %s492_s1, 4  ;;  %s18_s16 = int_to_ptr.vmem [resolvable:$true] %s17_s16  ;;  %s29_s19 = int_to_ptr.hbm [resolvable:$true] %s28_s19 }
   0x4   :  { %s447_s20 = smov 128   ;;  %s448_s21 = smov 8  }
   0x5   :  { %23 = dma.hbm_to_vmem [thread:$0]  %s16_s14, 256, %s18_s16, [#allocation3], %s447_s20, %s447_s20, %s448_s21  }
   0x6   :  { %s449_s22 = smov [#allocation5]   ;;  %s450_s24 = smov 64  }
   0x7   :  { %s30_s23 = sshll.u32 %s449_s22, 4  ;;  %s451_s25 = smov 4   ;;  %s31_s23 = int_to_ptr.vmem [resolvable:$true] %s30_s23 }
   0x8   :  { %36 = dma.hbm_to_vmem [thread:$0]  %s29_s19, 2048, %s31_s23, [#allocation6], %s450_s24, %s450_s24, %s451_s25  }
   0x9   :  { %440 = dma.done.wait [#allocation3], 256  }
   0xa   :  { %441 = vsyncadd [#allocation3], 4294967040 }
   0xb   :  { %442 = dma.done.wait [#allocation6], 2048  }
   0xc   :  { %443 = vsyncadd [#allocation6], 4294965248  ;;  %v334_v0 = vld [vmem:[#allocation5 + $0x38] sm:$0xff]  ;;  %v333_v2 = vld [vmem:[#allocation5 + $0x30] sm:$0xff]  ;;  %s452_s26 = smov [#allocation7]   ;;  %s249_s29 = sshll.u32 %s494_s3, 4  ;;  %s250_s29 = int_to_ptr.hbm [resolvable:$true] %s249_s29 }
   0xd   :  { %v342_v1 = vld [vmem:[#allocation5 + $0x78] sm:$0xff]  ;;  %203 = vmatpush.bf16.msra.mxu0 %v334_v0  ;;  %v341_v3 = vld [vmem:[#allocation5 + $0x70] sm:$0xff]  ;;  %v332_v6 = vld [vmem:[#allocation5 + $0x28] sm:$0xff]  ;;  %s247_s27 = sshll.u32 %s452_s26, 4  ;;  %s248_s27 = int_to_ptr.vmem [resolvable:$true] %s247_s27 }
   0xe   :  { %217 = vmatpush.bf16.msra.mxu1 %v342_v1  ;;  %v47_v4 = vld [vmem:[#allocation2] sm:$0xff]  ;;  %v48_v5 = vld [vmem:[#allocation2 + $0x8] sm:$0xff]  ;;  %v340_v7 = vld [vmem:[#allocation5 + $0x68] sm:$0xff] }
   0xf   :  { %v49_v8 = vunpack.c.l.bf16 %v47_v4  ;;  %v51_v9 = vunpack.c.l.bf16 %v48_v5  ;;  %v50_v10 = vunpack.c.h.bf16 %v47_v4  ;;  %v52_v11 = vunpack.c.h.bf16 %v48_v5  ;;  %v331_v16 = vld [vmem:[#allocation5 + $0x20] sm:$0xff]  ;;  %v330_v18 = vld [vmem:[#allocation5 + $0x18] sm:$0xff]  ;;  %v329_v23 = vld [vmem:[#allocation5 + $0x10] sm:$0xff] }
  0x10   :  { %v339_v17 = vld [vmem:[#allocation5 + $0x60] sm:$0xff]  ;;  %v338_v19 = vld [vmem:[#allocation5 + $0x58] sm:$0xff]  ;;  %v337_v24 = vld [vmem:[#allocation5 + $0x50] sm:$0xff] }
  0x11   :  { %204 = vmatpush.bf16.msra.mxu0 %v333_v2  ;;  %v53_v12 = vmul.f32 0.5, %v49_v8  ;;  %v55_v13 = vmul.f32 0.5, %v51_v9  ;;  %v54_v14 = vmul.f32 0.5, %v50_v10  ;;  %v56_v15 = vmul.f32 0.5, %v52_v11  ;;  %v328_v30 = vld [vmem:[#allocation5 + $0x8] sm:$0xff]  ;;  %v327_v36 = vld [vmem:[#allocation5] sm:$0xff] }
  0x12   :  { %218 = vmatpush.bf16.msra.mxu1 %v341_v3  ;;  %v336_v31 = vld [vmem:[#allocation5 + $0x48] sm:$0xff]  ;;  %v335_v37 = vld [vmem:[#allocation5 + $0x40] sm:$0xff]  ;;  %v355_v40 = vld [vmem:[%s493_s2] ss:$0 sm:$0xff] }
  0x13   :  { %356 = vtanh.f32 %v53_v12 }
  0x14   :  { %358 = vtanh.f32 %v55_v13 }
  0x15   :  { %205 = vmatpush.bf16.msra.mxu0 %v332_v6  ;;  %360 = vtanh.f32 %v54_v14 }
  0x16   :  { %219 = vmatpush.bf16.msra.mxu1 %v340_v7  ;;  %362 = vtanh.f32 %v56_v15 }
  0x19   :  { %206 = vmatpush.bf16.msra.mxu0 %v331_v16  ;;  %v357_v20 = vpop.eup %356 }
  0x1a   :  { %220 = vmatpush.bf16.msra.mxu1 %v339_v17  ;;  %v359_v21 = vpop.eup %358  ;;  %v61_v26 = vadd.f32 1.0, %v357_v20 }
  0x1b   :  { %v361_v22 = vpop.eup %360  ;;  %v63_v27 = vadd.f32 1.0, %v359_v21 }
  0x1c   :  { %v363_v25 = vpop.eup %362  ;;  %v62_v28 = vadd.f32 1.0, %v361_v22  ;;  %v65_v32 = vmul.f32 %v61_v26, %v53_v12 }
  0x1d   :  { %207 = vmatpush.bf16.msra.mxu0 %v330_v18  ;;  %v64_v29 = vadd.f32 1.0, %v363_v25  ;;  %v67_v33 = vmul.f32 %v63_v27, %v55_v13 }
  0x1e   :  { %221 = vmatpush.bf16.msra.mxu1 %v338_v19  ;;  %v66_v34 = vmul.f32 %v62_v28, %v54_v14 }
  0x1f   :  { %v68_v35 = vmul.f32 %v64_v29, %v56_v15  ;;  %v69_v38 = vpack.c.bf16 %v67_v33, %v65_v32 }
  0x21   :  { %208 = vmatpush.bf16.msra.mxu0 %v329_v23  ;;  %v70_v39 = vpack.c.bf16 %v68_v35, %v66_v34 }
  0x22   :  { %222 = vmatpush.bf16.msra.mxu1 %v337_v24 }
  0x25   :  { %209 = vmatpush.bf16.msra.mxu0 %v328_v30 }
  0x26   :  { %223 = vmatpush.bf16.msra.mxu1 %v336_v31 }
  0x29   :  { %210 = vmatpush.bf16.msra.mxu0 %v327_v36 }
  0x2a   :  { %224 = vmatpush.bf16.msra.mxu1 %v335_v37 }
  0x2c   :  { %211 = vmatmul.bf16.vlgmr.msra.gmra.mxu0 %v69_v38 }
  0x2d   :  { %225 = vmatmul.bf16.vlgmr.msra.gmra.mxu1 %v70_v39 }
  0xa9   :  { %v212_v41 = vpop.f32.mrf.mxu0 }
  0xaa   :  { %v226_v42 = vpop.f32.mrf.mxu1  ;;  %v213_v43 = vadd.f32 %v355_v40, %v212_v41 }
  0xac   :  { %v227_v44 = vadd.f32 %v226_v42, %v213_v43 }
  0xae   :  { %v231_v45 = vmul.f32 0.5, %v227_v44 }
  0xb0   :  { %364 = vtanh.f32 %v231_v45 }
  0xb1   :  { %v214_v46 = vpop.f32.mrf.mxu0 }
  0xb2   :  { %v215_v47 = vadd.f32 %v355_v40, %v214_v46  ;;  %v228_v48 = vpop.f32.mrf.mxu1 }
  0xb4   :  { %v229_v49 = vadd.f32 %v228_v48, %v215_v47 }
  0xb6   :  { %v232_v50 = vmul.f32 0.5, %v229_v49  ;;  %v365_v51 = vpop.eup %364 }
  0xb7   :  { %v235_v52 = vadd.f32 1.0, %v365_v51 }
  0xb8   :  { %366 = vtanh.f32 %v232_v50 }
  0xb9   :  { %v237_v55 = vmul.f32 %v235_v52, %v231_v45 }
  0xbe   :  { %v367_v53 = vpop.eup %366 }
  0xbf   :  { %v236_v54 = vadd.f32 1.0, %v367_v53 }
  0xc1   :  { %v238_v56 = vmul.f32 %v236_v54, %v232_v50 }
  0xc3   :  { %v346_v57 = vpack.c.bf16 %v238_v56, %v237_v55 }
  0xc5   :  { %347 = vst [vmem:[#allocation7] sm:$0xff] %v346_v57  }
  0xc6   :  { %255 = dma.vmem_to_hbm [thread:$0]  %s248_s27, 128, %s250_s29, [#allocation4], %s450_s24, %s450_s24, %s451_s25  }
  0xc7   :  { %444 = dma.done.wait [#allocation4], 128  }
  0xc8   :  { %445 = vsyncadd [#allocation4], 4294967168 }
  0xc9   :  { %260 = vsyncpa [#allocation3], 1 }
  0xca   :  { %261 = vsyncpa [#allocation6], 1 }
  0xcb   :  { %262 = vsyncpa [#allocation4], 1 }

</bundles_post_ra>
